<compile_context>
chip_gen: v5e
topology: v5e:2x2
jax: 0.10.0
libtpu: 0.0.40
codegen_flags: <defaults>
</compile_context>

<pallas_src>
import functools

import jax
import jax.numpy as jnp
from jax import lax
from jax.experimental import pallas as pl
from jax.experimental.pallas import tpu as pltpu

_LANES = 128
_SUBLANES = 8
# 2048 x 128 f32 = 1 MiB per input tile -> ~4 MiB pipelined VMEM footprint.
_TARGET_BLOCK_ROWS = 2048


def _dice_partials_kernel(x_ref, t_ref, out_ref, *, n_valid, block_rows, need_mask):
    """Per-block partial sums: [sum(sigmoid(x)*t), sum(sigmoid(x)), sum(t)].

    Each partial is folded over the sublane (row) axis only, producing a
    (1, 128) lane vector per quantity; the cheap cross-lane/-block reduce
    happens outside the kernel.
    """
    x = x_ref[...].astype(jnp.float32)
    t = t_ref[...].astype(jnp.float32)
    s = jax.nn.sigmoid(x)
    st = s * t

    if need_mask:
        # Mask out (a) wrapper zero-padding beyond the true element count and
        # (b) garbage rows from an overhanging last grid block.
        row = lax.broadcasted_iota(jnp.int32, x.shape, 0)
        lane = lax.broadcasted_iota(jnp.int32, x.shape, 1)
        flat = (pl.program_id(0) * block_rows + row) * _LANES + lane
        valid = flat < n_valid
        st = jnp.where(valid, st, 0.0)
        s = jnp.where(valid, s, 0.0)
        t = jnp.where(valid, t, 0.0)

    out_ref[0:1, 0:1, :] = jnp.sum(st, axis=0, keepdims=True)[None]
    out_ref[0:1, 1:2, :] = jnp.sum(s, axis=0, keepdims=True)[None]
    out_ref[0:1, 2:3, :] = jnp.sum(t, axis=0, keepdims=True)[None]


def _round_up(x, m):
    return ((x + m - 1) // m) * m


@jax.jit
def dice_loss(inputs, targets, smooth=1.0):
    # Flatten in native dtype (no upcast -> half the HBM bytes for bf16 inputs).
    x = jnp.reshape(inputs, (-1,))
    t = jnp.reshape(targets, (-1,))
    n = x.shape[0]

    # Pad the flat length up to a multiple of 8*128 so it can be viewed as
    # (rows, 128) with rows % 8 == 0.  Padded elements are masked in-kernel,
    # so plain zero padding works for any dtype.  No copy when already aligned.
    n_pad = _round_up(n, _SUBLANES * _LANES)
    if n_pad != n:
        x = jnp.pad(x, (0, n_pad - n))
        t = jnp.pad(t, (0, n_pad - n))

    rows = n_pad // _LANES
    x2 = x.reshape(rows, _LANES)
    t2 = t.reshape(rows, _LANES)

    block_rows = min(_TARGET_BLOCK_ROWS, rows)   # multiple of 8 by construction
    grid = pl.cdiv(rows, block_rows)
    need_mask = (n_pad != n) or (rows % block_rows != 0)

    kernel = functools.partial(
        _dice_partials_kernel,
        n_valid=n,
        block_rows=block_rows,
        need_mask=need_mask,
    )

    partials = pl.pallas_call(
        kernel,
        out_shape=jax.ShapeDtypeStruct((grid, 3, _LANES), jnp.float32),
        grid_spec=pltpu.PrefetchScalarGridSpec(
            num_scalar_prefetch=0,
            grid=(grid,),
            in_specs=[
                pl.BlockSpec((block_rows, _LANES), lambda i: (i, 0)),
                pl.BlockSpec((block_rows, _LANES), lambda i: (i, 0)),
            ],
            out_specs=pl.BlockSpec((1, 3, _LANES), lambda i: (i, 0, 0)),
        ),
        compiler_params=pltpu.CompilerParams(
            dimension_semantics=("parallel",),
        ),
    )(x2, t2)

    sums = jnp.sum(partials, axis=(0, 2))  # (3,) = [intersection, sum_sigmoid, sum_targets]
    intersection, sum_s, sum_t = sums[0], sums[1], sums[2]
    dice = (2.0 * intersection + smooth) / (sum_s + sum_t + smooth)
    return 1.0 - dice


def _dice_loss_ref(inputs, targets, smooth=1.0):
    x = jax.nn.sigmoid(inputs.astype(jnp.float32)).reshape(-1)
    t = targets.astype(jnp.float32).reshape(-1)
    inter = jnp.sum(x * t)
    dice = (2.0 * inter + smooth) / (jnp.sum(x) + jnp.sum(t) + smooth)
    return 1.0 - dice


if __name__ == "__main__":
    key = jax.random.PRNGKey(0)
    k1, k2, k3, k4 = jax.random.split(key, 4)

    # Primary test: NCHW segmentation-style logits / binary mask.
    inputs = jax.random.normal(k1, (2, 4, 16, 16), dtype=jnp.float32)
    targets = (jax.random.uniform(k2, (2, 4, 16, 16)) > 0.5).astype(jnp.float32)
    loss = dice_loss(inputs, targets, smooth=1.0)
    jax.block_until_ready(loss)
    ref = _dice_loss_ref(inputs, targets, smooth=1.0)
    assert jnp.allclose(loss, ref, atol=1e-5, rtol=1e-5), (loss, ref)

    # Secondary test: un-aligned size exercising the zero-pad + in-kernel
    # masking path and a multi-block (overhanging last block) grid.
    inputs2 = jax.random.normal(k3, (1, 1, 520, 520), dtype=jnp.float32)
    targets2 = (jax.random.uniform(k4, (1, 1, 520, 520)) > 0.5).astype(jnp.float32)
    loss2 = dice_loss(inputs2, targets2, smooth=1.0)
    jax.block_until_ready(loss2)
    ref2 = _dice_loss_ref(inputs2, targets2, smooth=1.0)
    assert jnp.allclose(loss2, ref2, atol=1e-4, rtol=1e-4), (loss2, ref2)

    print("KERNEL_OK")
</pallas_src>

<mosaic_0001>
module attributes {stable_mosaic.version = 11 : i64} {
  func.func @_dice_partials_kernel(%arg0: i32, %arg1: memref<16x128xf32, #tpu.memory_space<vmem>>, %arg2: memref<16x128xf32, #tpu.memory_space<vmem>>, %arg3: memref<1x3x128xf32, #tpu.memory_space<vmem>>) attributes {dimension_semantics = [#tpu.dimension_semantics<parallel>], iteration_bounds = array<i64: 1>, scalar_prefetch = 0 : i64, scratch_operands = 0 : i64, tpu.core_type = #tpu.core_type<tc>, window_params = [{transform_indices = @transform_0, window_bounds = array<i64: 16, 128>}, {transform_indices = @transform_1, window_bounds = array<i64: 16, 128>}, {transform_indices = @transform_2, window_bounds = array<i64: 1, 3, 128>}]} {
    %c0 = arith.constant 0 : index
    %c0_0 = arith.constant 0 : index
    %0 = vector.load %arg1[%c0, %c0_0] : memref<16x128xf32, #tpu.memory_space<vmem>>, vector<16x128xf32>
    %c0_1 = arith.constant 0 : index
    %c0_2 = arith.constant 0 : index
    %1 = vector.load %arg2[%c0_1, %c0_2] : memref<16x128xf32, #tpu.memory_space<vmem>>, vector<16x128xf32>
    %2 = arith.negf %0 : vector<16x128xf32>
    %3 = math.exp %2 : vector<16x128xf32>
    %cst = arith.constant 1.000000e+00 : f32
    %4 = vector.broadcast %cst : f32 to vector<16x128xf32>
    %5 = arith.addf %4, %3 : vector<16x128xf32>
    %6 = arith.divf %4, %5 : vector<16x128xf32>
    %7 = arith.mulf %6, %1 : vector<16x128xf32>
    %cst_3 = arith.constant dense<0.000000e+00> : vector<128xf32>
    %8 = vector.multi_reduction <add>, %7, %cst_3 [0] : vector<16x128xf32> to vector<128xf32>
    %9 = vector.shape_cast %8 : vector<128xf32> to vector<1x128xf32>
    %10 = vector.shape_cast %9 : vector<1x128xf32> to vector<1x1x128xf32>
    %c0_4 = arith.constant 0 : index
    %c0_5 = arith.constant 0 : index
    %c0_6 = arith.constant 0 : index
    %11 = vector.load %arg3[%c0_4, %c0_5, %c0_6] : memref<1x3x128xf32, #tpu.memory_space<vmem>>, vector<1x1x128xf32>
    tpu.vector_store %arg3[%c0_4, %c0_5, %c0_6], %10 {strides = array<i32>} : memref<1x3x128xf32, #tpu.memory_space<vmem>>, vector<1x1x128xf32>,
    %cst_7 = arith.constant dense<0.000000e+00> : vector<128xf32>
    %12 = vector.multi_reduction <add>, %6, %cst_7 [0] : vector<16x128xf32> to vector<128xf32>
    %13 = vector.shape_cast %12 : vector<128xf32> to vector<1x128xf32>
    %14 = vector.shape_cast %13 : vector<1x128xf32> to vector<1x1x128xf32>
    %c0_8 = arith.constant 0 : index
    %c1 = arith.constant 1 : index
    %c0_9 = arith.constant 0 : index
    %15 = vector.load %arg3[%c0_8, %c1, %c0_9] : memref<1x3x128xf32, #tpu.memory_space<vmem>>, vector<1x1x128xf32>
    tpu.vector_store %arg3[%c0_8, %c1, %c0_9], %14 {strides = array<i32>} : memref<1x3x128xf32, #tpu.memory_space<vmem>>, vector<1x1x128xf32>,
    %cst_10 = arith.constant dense<0.000000e+00> : vector<128xf32>
    %16 = vector.multi_reduction <add>, %1, %cst_10 [0] : vector<16x128xf32> to vector<128xf32>
    %17 = vector.shape_cast %16 : vector<128xf32> to vector<1x128xf32>
    %18 = vector.shape_cast %17 : vector<1x128xf32> to vector<1x1x128xf32>
    %c0_11 = arith.constant 0 : index
    %c2 = arith.constant 2 : index
    %c0_12 = arith.constant 0 : index
    %19 = vector.load %arg3[%c0_11, %c2, %c0_12] : memref<1x3x128xf32, #tpu.memory_space<vmem>>, vector<1x1x128xf32>
    tpu.vector_store %arg3[%c0_11, %c2, %c0_12], %18 {strides = array<i32>} : memref<1x3x128xf32, #tpu.memory_space<vmem>>, vector<1x1x128xf32>,
    return
  }
  func.func @transform_0(%arg0: i32) -> (i32, i32) {
    %c0_i32 = arith.constant 0 : i32
    %c0_i32_0 = arith.constant 0 : i32
    return %arg0, %c0_i32 : i32, i32
  }
  func.func @transform_1(%arg0: i32) -> (i32, i32) {
    %c0_i32 = arith.constant 0 : i32
    %c0_i32_0 = arith.constant 0 : i32
    return %arg0, %c0_i32 : i32, i32
  }
  func.func @transform_2(%arg0: i32) -> (i32, i32, i32) {
    %c0_i32 = arith.constant 0 : i32
    %c0_i32_0 = arith.constant 0 : i32
    %c0_i32_1 = arith.constant 0 : i32
    return %arg0, %c0_i32, %c0_i32_0 : i32, i32, i32
  }
}

</mosaic_0001>

<bundles_post_ra>
// kernel: dice_loss.1
= control target key start
LH: loop header
LB: loop body
LE: loop exit
PB: predicated region body
PF: predicated region fallthrough
CT: control target
= control target key end

     0   :  { %s129_s0 = inlined_call_operand.vmem [shape: f32[16,128], index: 0, kind: input, shape index: {}]   ;;  %s130_s1 = inlined_call_operand.vmem [shape: f32[16,128], index: 1, kind: input, shape index: {}]   ;;  %s131_s2 = inlined_call_operand.vmem [shape: f32[1,3,128], index: 2, kind: output, shape index: {}]  }
   0x1   :  { %v11_v0 = vld [vmem:[%s129_s0] sm:$0xff]  ;;  %v12_v1 = vld [vmem:[%s129_s0 + $0x8] sm:$0xff] }
   0x2   :  { %v13_v2 = vld [vmem:[%s130_s1] sm:$0xff]  ;;  %v14_v3 = vld [vmem:[%s130_s1 + $0x8] sm:$0xff]  ;;  %v83_v4 = vmul.f32 -1.442695, %v11_v0  ;;  %v84_v5 = vmul.f32 -1.442695, %v12_v1 }
   0x3   :  { %v71_v6 = vadd.f32 %v14_v3, %v13_v2 }
   0x4   :  { %85 = vpow2.f32 %v83_v4 }
   0x5   :  { %87 = vpow2.f32 %v84_v5  ;;  %v72_v7 = vrot.slane %v71_v6, 4 }
   0x7   :  { %v73_v8 = vadd.f32 %v72_v7, %v71_v6 }
   0x9   :  { %v74_v9 = vrot.slane %v73_v8, 2 }
   0xa   :  { %v86_v10 = vpop.eup %85 }
   0xb   :  { %v88_v11 = vpop.eup %87  ;;  %v21_v12 = vadd.f32 1.0, %v86_v10  ;;  %v75_v13 = vadd.f32 %v74_v9, %v73_v8 }
   0xc   :  { %v22_v14 = vadd.f32 1.0, %v88_v11 }
   0xd   :  { %89 = vrcp.f32 %v21_v12  ;;  %v76_v15 = vrot.slane %v75_v13, 1  ;;  %vm28_vm0 = vweird.f32 %v21_v12  ;;  %v34_v20 = vand.u32 2147483648, %v21_v12 }
   0xe   :  { %91 = vrcp.f32 %v22_v14  ;;  %v32_v23 = vand.u32 2147483647, %v21_v12  ;;  %v49_v24 = vand.u32 2147483648, %v22_v14  ;;  %vm43_vm2 = vweird.f32 %v22_v14 }
   0xf   :  { %v77_v16 = vadd.f32 %v76_v15, %v75_v13  ;;  %v47_v26 = vand.u32 2147483647, %v22_v14  ;;  %v35_v28 = vor.u32 1.1754944e-38, %v34_v20 }
  0x10   :  { %vm33_vm5 = vcmp.eq.f32.partialorder %v32_v23, 8.507059e+37  ;;  %v50_v31 = vor.u32 1.1754944e-38, %v49_v24 }
  0x11   :  { %78 = vst [vmem:[%s131_s2 + $0x2] sm:$0x1] %v77_v16  ;;  %vm48_vm7 = vcmp.eq.f32.partialorder %v47_v26, 8.507059e+37 }
  0x13   :  { %v90_v17 = vpop.eup %89 }
  0x14   :  { %v92_v18 = vpop.eup %91  ;;  %v24_v19 = vmul.f32 %v90_v17, %v21_v12  ;;  %vm29_vm1 = vweird.f32 %v90_v17 }
  0x15   :  { %v39_v21 = vmul.f32 %v92_v18, %v22_v14  ;;  %vm44_vm3 = vweird.f32 %v92_v18  ;;  %vm30_vm4 = vmor %vm28_vm0, %vm29_vm1 }
  0x16   :  { %v25_v22 = vsub.f32 1.0, %v24_v19  ;;  %vm45_vm6 = vmor %vm43_vm2, %vm44_vm3 }
  0x17   :  { %v40_v25 = vsub.f32 1.0, %v39_v21 }
  0x18   :  { %v26_v27 = vmul.f32 %v90_v17, %v25_v22 }
  0x19   :  { %v41_v29 = vmul.f32 %v92_v18, %v40_v25 }
  0x1a   :  { %v27_v30 = vadd.f32 %v90_v17, %v26_v27 }
  0x1b   :  { %v42_v32 = vadd.f32 %v92_v18, %v41_v29 }
  0x1c   :  { %v31_v33 = vsel %vm30_vm4, %v90_v17, %v27_v30 }
  0x1d   :  { %v36_v34 = vsel %vm33_vm5, %v35_v28, %v31_v33  ;;  %v46_v35 = vsel %vm45_vm6, %v92_v18, %v42_v32 }
  0x1e   :  { %v51_v36 = vsel %vm48_vm7, %v50_v31, %v46_v35  ;;  %v53_v37 = vmul.f32 %v36_v34, %v13_v2 }
  0x1f   :  { %v54_v38 = vmul.f32 %v51_v36, %v14_v3  ;;  %v63_v39 = vadd.f32 %v51_v36, %v36_v34 }
  0x21   :  { %v55_v40 = vadd.f32 %v54_v38, %v53_v37  ;;  %v64_v41 = vrot.slane %v63_v39, 4 }
  0x23   :  { %v56_v42 = vrot.slane %v55_v40, 4  ;;  %v65_v43 = vadd.f32 %v64_v41, %v63_v39 }
  0x25   :  { %v57_v44 = vadd.f32 %v56_v42, %v55_v40  ;;  %v66_v45 = vrot.slane %v65_v43, 2 }
  0x27   :  { %v58_v46 = vrot.slane %v57_v44, 2  ;;  %v67_v47 = vadd.f32 %v66_v45, %v65_v43 }
  0x29   :  { %v59_v48 = vadd.f32 %v58_v46, %v57_v44  ;;  %v68_v49 = vrot.slane %v67_v47, 1 }
  0x2b   :  { %v60_v50 = vrot.slane %v59_v48, 1  ;;  %v69_v51 = vadd.f32 %v68_v49, %v67_v47 }
  0x2d   :  { %v61_v52 = vadd.f32 %v60_v50, %v59_v48  ;;  %70 = vst [vmem:[%s131_s2 + $0x1] sm:$0x1] %v69_v51 }
  0x2f   :  { %62 = vst [vmem:[%s131_s2] sm:$0x1] %v61_v52 }

</bundles_post_ra>
